<compile_context>
chip_gen: v7x
topology: tpu7x:2x2x1
jax: 0.10.0
libtpu: 0.0.40
codegen_flags: <defaults>
</compile_context>

<pallas_src>
import functools

import numpy as np
import jax
import jax.numpy as jnp
from jax.experimental import pallas as pl
from jax.experimental.pallas import tpu as pltpu

# TODO(synk): PRIMITIVES_SPECTRAL / OPS_SPECTORAL_NORM / calculate_stable_rank
# are external to the provided source; we use a representative
# ReLU->Conv->BN primitive set and Frobenius^2 / sigma_max^2 of the flattened
# kernel as a deterministic stable-rank proxy (only affects the fixed mixing
# weights, not the kernel structure).
PRIMITIVES_SPECTRAL = ["conv_3x3", "conv_1x1"]
PRIM_KSIZE = {"conv_3x3": 3, "conv_1x1": 1}

BN_EPS = 1e-5


def _round_up(x, m):
    return (x + m - 1) // m * m


@functools.lru_cache(maxsize=None)
def _row_tile_budget():
    """Generation-aware scoped-VMEM budget for row-tiled elementwise kernels:
    ~24 MiB on 128-MiB-VMEM parts (v5e/v6e), 8 MiB on 64-MiB parts (v7x)."""
    try:
        cap = pltpu.get_tpu_info().vmem_capacity_bytes
    except Exception:  # conservative fallback if the query is unavailable
        cap = 64 << 20
    return (24 << 20) if cap >= (96 << 20) else (8 << 20)


def _pick_rows(rows, lanes, n_streams):
    """Row-tile cap: large enough to amortize per-step overhead, small enough
    that n_streams double-buffered (TR, lanes) tiles stay inside the
    generation-aware scoped-VMEM budget."""
    budget = _row_tile_budget()
    tr = min(_round_up(rows, 8), 1024)
    while tr > 8 and n_streams * tr * lanes * 4 * 2 > budget:
        tr //= 2
    return max(_round_up(tr, 8), 8)


def _choose_tile(n, cap):
    """Largest multiple-of-8 tile <= cap that exactly divides n (0 if none)."""
    best = 0
    for t in range(8, min(cap, n) + 1, 8):
        if n % t == 0:
            best = t
    return best


def _pack_factor(rows, C):
    """Lane-dense repack factor: fold `rep` rows into the 128-lane dim when the
    channel count divides 128 (per-channel scales stay periodic in lanes)."""
    if C < 128 and 128 % C == 0 and rows % (128 // C) == 0:
        return 128 // C
    return 1


# ----------------------------------------------------------------------------
# Tiled bf16 MXU matmul with fused per-channel sum / sum-of-squares epilogue
# (f32 accumulation; single-K-step case skips the scratch and the predicates)
# ----------------------------------------------------------------------------
def _mm_stats_kernel(a_ref, b_ref, o_ref, st_ref, *acc, multi_k):
    def finish(out_f32):
        o_ref[...] = out_f32.astype(o_ref.dtype)
        s = jnp.sum(out_f32, axis=0, keepdims=True)
        q = jnp.sum(out_f32 * out_f32, axis=0, keepdims=True)
        pad = jnp.zeros((6, out_f32.shape[1]), jnp.float32)
        st_ref[...] = jnp.concatenate([s, q, pad], axis=0)

    if multi_k:
        acc_ref = acc[0]

        @pl.when(pl.program_id(2) == 0)
        def _():
            acc_ref[...] = jnp.zeros_like(acc_ref)

        acc_ref[...] += jnp.dot(a_ref[...], b_ref[...],
                                preferred_element_type=jnp.float32)

        @pl.when(pl.program_id(2) == pl.num_programs(2) - 1)
        def _():
            finish(acc_ref[...])
    else:
        finish(jnp.dot(a_ref[...], b_ref[...],
                       preferred_element_type=jnp.float32))


def pallas_matmul(a, b_padded, n_valid):
    """(M, Kp) bf16 activations (K already padded by the caller) @ pre-padded
    bf16 (Kp, Np) weights.  Returns:
        out   : bf16 (M, n_valid)
        sums  : f32 (n_valid,)  per-output-channel sum over the M rows
        sumsq : f32 (n_valid,)  per-output-channel sum of squares
    Padded M rows are explicit zeros, so they contribute nothing to the stats.
    """
    M, Ka = a.shape
    Kp, Np = b_padded.shape
    assert Ka == Kp, (Ka, Kp)
    a = a.astype(jnp.bfloat16)

    TM = min(_round_up(M, 8), 512)
    if M % TM != 0:
        alt = _choose_tile(M, 512)
        if alt >= 64:          # prefer a dividing tile over an M pad-copy
            TM = alt
    Mp = _round_up(M, TM)
    if Mp != M:
        a = jnp.zeros((Mp, Kp), jnp.bfloat16).at[:M, :].set(a)

    TN = 256 if Np % 256 == 0 else 128
    if Kp <= 512:
        TK = Kp
    elif Kp % 256 == 0:
        TK = 256
    else:
        TK = 128
    mi, nj, nk = Mp // TM, Np // TN, Kp // TK
    multi_k = nk > 1

    if multi_k:
        grid = (mi, nj, nk)
        in_specs = [pl.BlockSpec((TM, TK), lambda i, j, k: (i, k)),
                    pl.BlockSpec((TK, TN), lambda i, j, k: (k, j))]
        out_specs = (pl.BlockSpec((TM, TN), lambda i, j, k: (i, j)),
                     pl.BlockSpec((8, TN), lambda i, j, k: (i, j)))
        scratch = [pltpu.VMEM((TM, TN), jnp.float32)]
        dims = ("parallel", "parallel", "arbitrary")
    else:
        grid = (mi, nj)
        in_specs = [pl.BlockSpec((TM, TK), lambda i, j: (i, 0)),
                    pl.BlockSpec((TK, TN), lambda i, j: (0, j))]
        out_specs = (pl.BlockSpec((TM, TN), lambda i, j: (i, j)),
                     pl.BlockSpec((8, TN), lambda i, j: (i, j)))
        scratch = []
        dims = ("parallel", "parallel")

    out, st = pl.pallas_call(
        functools.partial(_mm_stats_kernel, multi_k=multi_k),
        out_shape=(jax.ShapeDtypeStruct((Mp, Np), jnp.bfloat16),
                   jax.ShapeDtypeStruct((mi * 8, Np), jnp.float32)),
        grid_spec=pltpu.PrefetchScalarGridSpec(
            num_scalar_prefetch=0, grid=grid,
            in_specs=in_specs, out_specs=out_specs,
            scratch_shapes=scratch),
        compiler_params=pltpu.CompilerParams(dimension_semantics=dims),
    )(a, b_padded)

    st = st.reshape(mi, 8, Np)
    sums = jnp.sum(st[:, 0, :n_valid], axis=0)
    sumsq = jnp.sum(st[:, 1, :n_valid], axis=0)
    return out[:M, :n_valid], sums, sumsq


def conv2d(x, wp, stride, pad):
    """NHWC conv, no bias.  wp carries a pre-padded bf16 (Kp, Np) weight matrix.
    Returns (y_bf16 NHWC, per-channel sums, per-channel sum-of-squares, rows)."""
    N_, H, W_, Cin = x.shape
    KH, KW, Cout = wp["kh"], wp["kw"], wp["cout"]
    Kp = wp["mat"].shape[0]
    if KH == 1 and KW == 1 and pad == 0:
        if stride > 1:
            x = x[:, ::stride, ::stride, :]
        OH, OW = x.shape[1], x.shape[2]
        M = N_ * OH * OW
        a = x.reshape(M, Cin).astype(jnp.bfloat16)
        if Kp != Cin:
            a = jnp.zeros((M, Kp), jnp.bfloat16).at[:, :Cin].set(a)
    else:
        # TODO(synk): the KHxKW im2col is still materialized (bf16, K-padding
        # folded into the same concat so no second pad-copy); fully fusing it
        # into the matmul BlockSpec needs element-offset H/W windows
        # (pl.Element) and is left as a follow-up.
        OH = (H + 2 * pad - KH) // stride + 1
        OW = (W_ + 2 * pad - KW) // stride + 1
        M = N_ * OH * OW
        xpd = jnp.pad(x.astype(jnp.bfloat16),
                      ((0, 0), (pad, pad), (pad, pad), (0, 0)))
        cols = [xpd[:, kh:kh + stride * OH:stride, kw:kw + stride * OW:stride, :]
                for kh in range(KH) for kw in range(KW)]
        K = KH * KW * Cin
        if Kp != K:
            cols.append(jnp.zeros((N_, OH, OW, Kp - K), jnp.bfloat16))
        a = jnp.concatenate(cols, axis=-1).reshape(M, Kp)
    y, sums, sumsq = pallas_matmul(a, wp["mat"], Cout)
    return y.reshape(N_, OH, OW, Cout), sums, sumsq, M


# ----------------------------------------------------------------------------
# Fused per-channel scale/shift weighted sum (+ optional ReLU / dual output)
# ----------------------------------------------------------------------------
def _scale_shift_sum_kernel(*refs, n_in, mode):
    ys, scale_ref, shift_ref = refs[:n_in], refs[n_in], refs[n_in + 1]
    outs = refs[n_in + 2:]
    acc = ys[0][...].astype(jnp.float32) * scale_ref[0:1, :]
    for p in range(1, n_in):
        acc = acc + ys[p][...].astype(jnp.float32) * scale_ref[p:p + 1, :]
    acc = acc + shift_ref[...]
    if mode == "raw":
        outs[0][...] = acc.astype(outs[0].dtype)
    elif mode == "relu":
        outs[0][...] = jnp.maximum(acc, 0.0).astype(outs[0].dtype)
    else:                                   # "both": raw + relu in one pass
        outs[0][...] = acc.astype(outs[0].dtype)
        outs[1][...] = jnp.maximum(acc, 0.0).astype(outs[1].dtype)


def scale_shift_sum(ys, scale, shift, mode):
    """out = sum_p ys[p] * scale[p] + shift  (per-channel), fused over branches.
    bf16 inputs, f32 math, bf16 outputs."""
    shp = ys[0].shape
    C = shp[-1]
    R = int(np.prod(shp[:-1]))
    P = len(ys)
    n_out = 2 if mode == "both" else 1
    rep = _pack_factor(R, C)
    Ck, Rk = C * rep, R // rep
    ys2 = [y.reshape(Rk, Ck) for y in ys]
    scale2 = jnp.tile(scale.reshape(P, C).astype(jnp.float32), (1, rep))
    shift2 = jnp.tile(shift.reshape(1, C).astype(jnp.float32), (1, rep))

    cap = _pick_rows(Rk, Ck, P + n_out)
    Rp = Rk
    if Rk <= cap:
        TR = Rk                        # single full-extent block: no padding
    else:
        TR = _choose_tile(Rk, cap)     # dividing tile: still no padding
        if TR == 0:
            TR = cap
            Rp = _round_up(Rk, TR)
            ys2 = [jnp.zeros((Rp, Ck), y.dtype).at[:Rk].set(y) for y in ys2]

    row_spec = pl.BlockSpec((TR, Ck), lambda i: (i, 0))
    outs = pl.pallas_call(
        functools.partial(_scale_shift_sum_kernel, n_in=P, mode=mode),
        out_shape=tuple(jax.ShapeDtypeStruct((Rp, Ck), jnp.bfloat16)
                        for _ in range(n_out)),
        grid_spec=pltpu.PrefetchScalarGridSpec(
            num_scalar_prefetch=0,
            grid=(Rp // TR,),
            in_specs=[row_spec] * P
                     + [pl.BlockSpec((P, Ck), lambda i: (0, 0)),
                        pl.BlockSpec((1, Ck), lambda i: (0, 0))],
            out_specs=tuple(row_spec for _ in range(n_out))),
        compiler_params=pltpu.CompilerParams(
            dimension_semantics=("parallel",)),
    )(*ys2, scale2, shift2)
    outs = [o[:Rk].reshape(shp) for o in outs]
    return outs[0] if n_out == 1 else (outs[0], outs[1])


def _bn_coeffs(sums, sumsq, count, eps=BN_EPS):
    # Note: E[x^2]-E[x]^2 in f32 from the matmul's f32 accumulator; clamped >=0.
    mean = sums / count
    var = jnp.maximum(sumsq / count - mean * mean, 0.0)
    inv = jax.lax.rsqrt(var + eps)
    return mean, inv


def batchnorm_apply(y, sums, sumsq, count, gamma=None, beta=None, relu=False,
                    eps=BN_EPS):
    """Training-mode BatchNorm2d (+ optional fused ReLU), using the statistics
    already produced by the conv matmul epilogue."""
    mean, inv = _bn_coeffs(sums, sumsq, count, eps)
    g = inv if gamma is None else gamma * inv
    b = -mean * g if beta is None else beta - mean * g
    return scale_shift_sum([y], g.reshape(1, -1), b.reshape(1, -1),
                           mode="relu" if relu else "raw")


def fused_node(branch_ys, branch_stats, branch_ws, mode, eps=BN_EPS):
    """sum over branches of  w_p * BatchNorm(y_p)  (affine=False, batch stats),
    fused into a single scale/shift-sum kernel.  Mixing weights are compile-time
    Python floats folded into the per-channel scales; BN stats come from the
    conv matmul epilogues (no extra stats pass)."""
    scales = []
    shift = 0.0
    for (sums, sumsq, count), w in zip(branch_stats, branch_ws):
        mean, inv = _bn_coeffs(sums, sumsq, count, eps)
        scales.append(w * inv)
        shift = shift - w * mean * inv
    return scale_shift_sum(branch_ys, jnp.stack(scales, axis=0), shift, mode)


# ----------------------------------------------------------------------------
# Global average pool + classifier head (tiled reduction + matmul epilogue)
# ----------------------------------------------------------------------------
def _head_kernel(x_ref, w_ref, b_ref, o_ref, acc_ref, *, inv_hw):
    @pl.when(pl.program_id(0) == 0)
    def _():
        acc_ref[...] = jnp.zeros_like(acc_ref)

    acc_ref[...] += jnp.sum(x_ref[...].astype(jnp.float32), axis=1)

    @pl.when(pl.program_id(0) == pl.num_programs(0) - 1)
    def _():
        pooled = acc_ref[...] * inv_hw
        o_ref[...] = (jnp.dot(pooled, w_ref[...],
                              preferred_element_type=jnp.float32) + b_ref[...])


def head_forward(x, w, b):
    N_, H, W_, C = x.shape
    ncls = w.shape[1]
    HW = H * W_
    Np = _round_up(N_, 8)
    Cp = _round_up(C, 128)
    Op = _round_up(ncls, 128)
    THW = min(_round_up(HW, 8), 512)
    HWp = _round_up(HW, THW)
    x3 = jnp.zeros((Np, HWp, Cp), jnp.bfloat16).at[:N_, :HW, :C].set(
        x.reshape(N_, HW, C).astype(jnp.bfloat16))
    wp = jnp.zeros((Cp, Op), jnp.float32).at[:C, :ncls].set(w)
    bp = jnp.zeros((1, Op), jnp.float32).at[0, :ncls].set(b)
    out = pl.pallas_call(
        functools.partial(_head_kernel, inv_hw=1.0 / HW),
        out_shape=jax.ShapeDtypeStruct((Np, Op), jnp.float32),
        grid_spec=pltpu.PrefetchScalarGridSpec(
            num_scalar_prefetch=0,
            grid=(HWp // THW,),
            in_specs=[pl.BlockSpec((Np, THW, Cp), lambda i: (0, i, 0)),
                      pl.BlockSpec((Cp, Op), lambda i: (0, 0)),
                      pl.BlockSpec((1, Op), lambda i: (0, 0))],
            out_specs=pl.BlockSpec((Np, Op), lambda i: (0, 0)),
            scratch_shapes=[pltpu.VMEM((Np, Cp), jnp.float32)]),
        compiler_params=pltpu.CompilerParams(
            dimension_semantics=("arbitrary",)),
    )(x3, wp, bp)
    return out[:N_, :ncls]


# ----------------------------------------------------------------------------
# Network (Cell / MixedOp / stems) — ReLUs hoisted and fused into producers
# ----------------------------------------------------------------------------
def cell_forward(cell, s0r, s1r, is_last):
    """s0r / s1r are already ReLU'd (every consumer applies ReLU first, so it is
    fused into the producing BN).  Returns the ReLU'd cell output, or the raw
    concat for the last cell (feeds the classifier head).  Assumes
    multiplier <= steps (preprocess outputs are never concatenated)."""
    if cell["reduction_prev"]:
        y1, su1, sq1, m = conv2d(s0r, cell["pre0"]["w1"], 2, 0)
        y2, su2, sq2, _ = conv2d(s0r[:, 1:, 1:, :], cell["pre0"]["w2"], 2, 0)
        pre0 = jnp.concatenate([y1, y2], axis=-1)
        pre0_stats = (jnp.concatenate([su1, su2]),
                      jnp.concatenate([sq1, sq2]), m)
    else:
        pre0, su, sq, m = conv2d(s0r, cell["pre0"]["w"], 1, 0)
        pre0_stats = (su, sq, m)
    pre1, su, sq, m1 = conv2d(s1r, cell["pre1"]["w"], 1, 0)
    # Preprocess BN (affine=False) with the MixedOps' shared leading ReLU fused.
    relu_states = [batchnorm_apply(pre0, *pre0_stats, relu=True),
                   batchnorm_apply(pre1, su, sq, m1, relu=True)]
    raw_nodes = []
    offset = 0
    for _ in range(cell["steps"]):
        n_states = len(relu_states)
        ys, stats, ws = [], [], []
        for j in range(n_states):
            op = cell["ops"][offset + j]
            h = relu_states[j]
            # TODO(synk): the two primitives' weight matrices could be
            # concatenated along N (1x1 embedded at the center tap) to share
            # one im2col read and fill a 256-wide MXU slab; kept separate here
            # to keep the node scale/shift fusion purely per-channel.
            for prim, wmat, wgt in zip(PRIMITIVES_SPECTRAL, op["convs"],
                                       op["weights"]):
                k = PRIM_KSIZE[prim]
                y, bsu, bsq, cnt = conv2d(h, wmat, op["stride"], k // 2)
                ys.append(y)
                stats.append((bsu, bsq, cnt))
                ws.append(wgt)
        offset += n_states
        if is_last:
            raw, rel = fused_node(ys, stats, ws, mode="both")
            raw_nodes.append(raw)
            relu_states.append(rel)
        else:
            relu_states.append(fused_node(ys, stats, ws, mode="relu"))
    if is_last:
        return jnp.concatenate(raw_nodes[-cell["multiplier"]:], axis=-1)
    return jnp.concatenate(relu_states[-cell["multiplier"]:], axis=-1)


def network_forward(params, x_nchw):
    x = jnp.transpose(x_nchw, (0, 2, 3, 1)).astype(jnp.float32)   # NCHW -> NHWC
    st0 = params["stem0"]
    y, su, sq, m = conv2d(x, st0["w0"], 2, 1)
    y = batchnorm_apply(y, su, sq, m, st0["g0"], st0["b0"], relu=True)
    y, su, sq, m = conv2d(y, st0["w1"], 2, 1)
    s0r = batchnorm_apply(y, su, sq, m, st0["g1"], st0["b1"], relu=True)
    st1 = params["stem1"]
    y, su, sq, m = conv2d(s0r, st1["w"], 2, 1)
    s1r = batchnorm_apply(y, su, sq, m, st1["g"], st1["b"], relu=True)
    out_raw = None
    cells = params["cells"]
    for idx, cell in enumerate(cells):
        is_last = idx == len(cells) - 1
        out = cell_forward(cell, s0r, s1r, is_last)
        if is_last:
            out_raw = out
        else:
            s0r, s1r = s1r, out
    return head_forward(out_raw, params["classifier"]["w"],
                        params["classifier"]["b"])


# ----------------------------------------------------------------------------
# Deterministic parameter initialization (weights padded/cast to bf16 ONCE)
# ----------------------------------------------------------------------------
def _stable_rank(w):
    m = np.asarray(w).astype(np.float64).reshape(-1, w.shape[-1])
    s = np.linalg.svd(m, compute_uv=False)
    return float((s ** 2).sum() / max(s[0] ** 2, 1e-12))


def _softmax_neg(vals):
    v = -np.asarray(vals, dtype=np.float64)
    v = v - v.max()
    e = np.exp(v)
    return tuple(float(t) for t in (e / e.sum()))


def init_params(key, C, num_classes, layers, steps=4, multiplier=4):
    keys = iter(jax.random.split(key, 4096))

    def conv_param(cin, cout, k):
        std = (2.0 / (cin * k * k)) ** 0.5
        w = jax.random.normal(next(keys), (k, k, cin, cout), jnp.float32) * std
        kdim = k * k * cin
        kp, npad = _round_up(kdim, 128), _round_up(cout, 128)
        mat = jnp.zeros((kp, npad), jnp.bfloat16).at[:kdim, :cout].set(
            w.reshape(kdim, cout).astype(jnp.bfloat16))
        return dict(mat=mat, kh=k, kw=k, cin=cin, cout=cout), w

    params = {}
    p00, _ = conv_param(3, C // 2, 3)
    p01, _ = conv_param(C // 2, C, 3)
    params["stem0"] = dict(
        w0=p00, g0=jnp.ones((C // 2,), jnp.float32),
        b0=jnp.zeros((C // 2,), jnp.float32),
        w1=p01, g1=jnp.ones((C,), jnp.float32),
        b1=jnp.zeros((C,), jnp.float32))
    p10, _ = conv_param(C, C, 3)
    params["stem1"] = dict(w=p10, g=jnp.ones((C,), jnp.float32),
                           b=jnp.zeros((C,), jnp.float32))

    cells = []
    C_pp, C_p, C_curr = C, C, C
    reduction_prev = True
    for i in range(layers):
        if i in [layers // 3, 2 * layers // 3]:
            C_curr *= 2
            reduction = True
        else:
            reduction = False
        cell = {"reduction": reduction, "reduction_prev": reduction_prev,
                "steps": steps, "multiplier": multiplier}
        if reduction_prev:
            cell["pre0"] = dict(w1=conv_param(C_pp, C_curr // 2, 1)[0],
                                w2=conv_param(C_pp, C_curr // 2, 1)[0])
        else:
            cell["pre0"] = dict(w=conv_param(C_pp, C_curr, 1)[0])
        cell["pre1"] = dict(w=conv_param(C_p, C_curr, 1)[0])
        ops = []
        for s in range(steps):
            for j in range(2 + s):
                stride = 2 if reduction and j < 2 else 1
                convs, srs = [], []
                for prim in PRIMITIVES_SPECTRAL:
                    k = PRIM_KSIZE[prim]
                    cp, raw = conv_param(C_curr, C_curr, k)
                    convs.append(cp)
                    srs.append(_stable_rank(raw))
                ops.append(dict(stride=stride, convs=convs,
                                weights=_softmax_neg(srs)))
        cell["ops"] = ops
        cells.append(cell)
        reduction_prev = reduction
        C_pp, C_p = C_p, multiplier * C_curr
    params["cells"] = cells
    params["classifier"] = dict(
        w=jax.random.normal(next(keys), (C_p, num_classes), jnp.float32)
          * (1.0 / np.sqrt(C_p)),
        b=jnp.zeros((num_classes,), jnp.float32))
    return params


# ----------------------------------------------------------------------------
if __name__ == "__main__":
    key = jax.random.PRNGKey(0)
    k_params, k_in = jax.random.split(key)

    C, num_classes, layers = 8, 10, 2
    params = init_params(k_params, C=C, num_classes=num_classes, layers=layers,
                         steps=4, multiplier=4)

    x = jax.random.normal(k_in, (2, 3, 32, 32), jnp.float32)   # NCHW like torch

    logits = network_forward(params, x)
    logits = jax.block_until_ready(logits)
    assert logits.shape == (2, num_classes), logits.shape
    assert bool(jnp.all(jnp.isfinite(logits)))
    print("KERNEL_OK")
</pallas_src>

<mosaic_0001>
module attributes {stable_mosaic.version = 11 : i64} {
  func.func @_mm_stats_kernel(%arg0: i32, %arg1: i32, %arg2: memref<512x128xbf16, #tpu.memory_space<vmem>>, %arg3: memref<128x128xbf16, #tpu.memory_space<vmem>>, %arg4: memref<512x128xbf16, #tpu.memory_space<vmem>>, %arg5: memref<8x128xf32, #tpu.memory_space<vmem>>) attributes {dimension_semantics = [#tpu.dimension_semantics<parallel>, #tpu.dimension_semantics<parallel>], iteration_bounds = array<i64: 1, 1>, scalar_prefetch = 0 : i64, scratch_operands = 0 : i64, tpu.core_type = #tpu.core_type<tc>, window_params = [{transform_indices = @transform_0, window_bounds = array<i64: 512, 128>}, {transform_indices = @transform_1, window_bounds = array<i64: 128, 128>}, {transform_indices = @transform_2, window_bounds = array<i64: 512, 128>}, {transform_indices = @transform_3, window_bounds = array<i64: 8, 128>}]} {
    %c0 = arith.constant 0 : index
    %c0_0 = arith.constant 0 : index
    %0 = vector.load %arg2[%c0, %c0_0] : memref<512x128xbf16, #tpu.memory_space<vmem>>, vector<512x128xbf16>
    %c0_1 = arith.constant 0 : index
    %c0_2 = arith.constant 0 : index
    %1 = vector.load %arg3[%c0_1, %c0_2] : memref<128x128xbf16, #tpu.memory_space<vmem>>, vector<128x128xbf16>
    %cst = arith.constant dense<0.000000e+00> : vector<512x128xf32>
    %2 = tpu.matmul %0, %1, %cst {dimension_numbers = #tpu.dot_dimension_numbers<[1], [0], [0], [1], [0, 0, 1, 1], [], []>} : vector<512x128xbf16>, vector<128x128xbf16>, vector<512x128xf32> -> vector<512x128xf32>
    %3 = arith.truncf %2 : vector<512x128xf32> to vector<512x128xbf16>
    %c0_3 = arith.constant 0 : index
    %c0_4 = arith.constant 0 : index
    %4 = vector.load %arg4[%c0_3, %c0_4] : memref<512x128xbf16, #tpu.memory_space<vmem>>, vector<512x128xbf16>
    tpu.vector_store %arg4[%c0_3, %c0_4], %3 {strides = array<i32>} : memref<512x128xbf16, #tpu.memory_space<vmem>>, vector<512x128xbf16>,
    %cst_5 = arith.constant dense<0.000000e+00> : vector<128xf32>
    %5 = vector.multi_reduction <add>, %2, %cst_5 [0] : vector<512x128xf32> to vector<128xf32>
    %6 = vector.shape_cast %5 : vector<128xf32> to vector<1x128xf32>
    %7 = arith.mulf %2, %2 : vector<512x128xf32>
    %cst_6 = arith.constant dense<0.000000e+00> : vector<128xf32>
    %8 = vector.multi_reduction <add>, %7, %cst_6 [0] : vector<512x128xf32> to vector<128xf32>
    %9 = vector.shape_cast %8 : vector<128xf32> to vector<1x128xf32>
    %cst_7 = arith.constant 0.000000e+00 : f32
    %10 = vector.broadcast %cst_7 : f32 to vector<6x128xf32>
    %11 = tpu.concatenate %6, %9, %10 in 0 : vector<1x128xf32>, vector<1x128xf32>, vector<6x128xf32> -> vector<8x128xf32>
    %c0_8 = arith.constant 0 : index
    %c0_9 = arith.constant 0 : index
    %12 = vector.load %arg5[%c0_8, %c0_9] : memref<8x128xf32, #tpu.memory_space<vmem>>, vector<8x128xf32>
    tpu.vector_store %arg5[%c0_8, %c0_9], %11 {strides = array<i32>} : memref<8x128xf32, #tpu.memory_space<vmem>>, vector<8x128xf32>,
    return
  }
  func.func @transform_0(%arg0: i32, %arg1: i32) -> (i32, i32) {
    %c0_i32 = arith.constant 0 : i32
    %c0_i32_0 = arith.constant 0 : i32
    return %arg0, %c0_i32 : i32, i32
  }
  func.func @transform_1(%arg0: i32, %arg1: i32) -> (i32, i32) {
    %c0_i32 = arith.constant 0 : i32
    %c0_i32_0 = arith.constant 0 : i32
    return %c0_i32, %arg1 : i32, i32
  }
  func.func @transform_2(%arg0: i32, %arg1: i32) -> (i32, i32) {
    %c0_i32 = arith.constant 0 : i32
    return %arg0, %arg1 : i32, i32
  }
  func.func @transform_3(%arg0: i32, %arg1: i32) -> (i32, i32) {
    %c0_i32 = arith.constant 0 : i32
    return %arg0, %arg1 : i32, i32
  }
}

</mosaic_0001>

<bundles_post_ra>
// kernel: tpu_custom_call.1
= control target key start
LH: loop header
LB: loop body
LE: loop exit
PB: predicated region body
PF: predicated region fallthrough
CT: control target
= control target key end

     0   :  { %9 = vsyncpa [#allocation3], 0  ;;  %s2124_s0 = inlined_call_operand.hbm [shape: bf16[512,128], index: 0, kind: input, shape index: {}]   ;;  %s2125_s1 = inlined_call_operand.hbm [shape: bf16[128,128], index: 1, kind: input, shape index: {}]   ;;  %s2126_s2 = inlined_call_operand.hbm [shape: bf16[512,128], index: 2, kind: output, shape index: {0}]   ;;  %s2127_s3 = inlined_call_operand.hbm [shape: f32[8,128], index: 3, kind: output, shape index: {1}]  }
   0x1   :  { %10 = vsyncpa [#allocation6], 0 }
   0x2   :  { %11 = vsyncpa [#allocation4], 0 }
   0x3   :  { %12 = vsyncpa [#allocation9], 0  ;;  %s1849_s12 = smov [#allocation2]   ;;  %s1753_s16 = scalar_lea.hbm %s2124_s0, 4096 }
   0x4   :  { %s18_s13 = sshll.u32 %s1849_s12, 4  ;;  %p1754_p0 = scmp.ne.s32.totalorder %s2124_s0, %s1753_s16  ;;  %s19_s13 = int_to_ptr.vmem [resolvable:$true] %s18_s13 }
   0x5   :  { %p1757_p1 = scmp.lt.u32.totalorder %s1753_s16, %s2124_s0 }
   0x7   :  { %p1759_p2 = pnand %p1757_p1, %p1754_p0 }
   0x9   :  { %1762 = shalt.err (!%p1759_p2)
}
   0xa   :  { %s1763_s21 = scalar_lea.vmem %s19_s13, 4096  ;;  %p1768_p4 = scmp.lt.s32.totalorder %s19_s13, %s19_s13 }
   0xb   :  { %p1764_p3 = scmp.ne.s32.totalorder %s19_s13, %s1763_s21  ;;  %p1769_p5 = scmp.lt.s32.totalorder %s1763_s21, %s1763_s21 }
   0xd   :  { %p1770_p6 = por %p1769_p5, %p1768_p4 }
   0xf   :  { %p1771_p7 = pnand %p1770_p6, %p1764_p3 }
  0x11   :  { %1774 = shalt.err (!%p1771_p7)
}
  0x12   :  { %s1850_s22 = smov 64   ;;  %s1851_s23 = smov 4  }
  0x13   :  { %24 = dma.hbm_to_vmem [thread:$0]  %s2124_s0, 4096, %s19_s13, [#allocation3], %s1850_s22, %s1850_s22, %s1851_s23  }
  0x14   :  { %s1852_s26 = smov [#allocation5]   ;;  %s1775_s30 = scalar_lea.hbm %s2125_s1, 1024 }
  0x15   :  { %s30_s27 = sshll.u32 %s1852_s26, 4  ;;  %p1776_p8 = scmp.ne.s32.totalorder %s2125_s1, %s1775_s30  ;;  %s31_s27 = int_to_ptr.vmem [resolvable:$true] %s30_s27 }
  0x16   :  { %p1779_p9 = scmp.lt.u32.totalorder %s1775_s30, %s2125_s1 }
  0x18   :  { %p1781_p10 = pnand %p1779_p9, %p1776_p8 }
  0x1a   :  { %1784 = shalt.err (!%p1781_p10)
}
  0x1b   :  { %s1785_s8 = scalar_lea.vmem %s31_s27, 1024  ;;  %p1790_p12 = scmp.lt.s32.totalorder %s31_s27, %s31_s27 }
  0x1c   :  { %p1786_p11 = scmp.ne.s32.totalorder %s31_s27, %s1785_s8  ;;  %p1791_p13 = scmp.lt.s32.totalorder %s1785_s8, %s1785_s8 }
  0x1e   :  { %p1792_p0 = por %p1791_p13, %p1790_p12 }
  0x20   :  { %p1793_p1 = pnand %p1792_p0, %p1786_p11 }
  0x22   :  { %1796 = shalt.err (!%p1793_p1)
}
  0x23   :  { %36 = dma.hbm_to_vmem [thread:$0]  %s2125_s1, 1024, %s31_s27, [#allocation6], %s1850_s22, %s1850_s22, %s1851_s23  }
  0x24   :  { %1841 = dma.done.wait [#allocation3], 4096  }
  0x25   :  { %1842 = vsyncadd [#allocation3], 4294963200 }
  0x26   :  { %1843 = dma.done.wait [#allocation6], 1024  }
  0x27   :  { %1844 = vsyncadd [#allocation6], 4294966272  ;;  %v1713_v0 = vld [vmem:[#allocation5] sm:$0xff]   ;;  %v1714_v1 = vld [vmem:[#allocation5 + $0x8] sm:$0xff]   ;;  %s1853_s1 = smov [#allocation7]  }
  0x28   :  { %1611 = vmatprep.subr.bf16.mxu0 %v1713_v0  ;;  %1691 = vmatprep.subr.bf16.mxu1 %v1713_v0  ;;  %v1715_v2 = vld [vmem:[#allocation5 + $0x10] sm:$0xff]   ;;  %v1716_v3 = vld [vmem:[#allocation5 + $0x18] sm:$0xff]   ;;  %v1721_v4 = vld [vmem:[#allocation2] sm:$0xff]   ;;  %s1185_s10 = sshll.u32 %s1853_s1, 4  ;;  %s1186_s10 = int_to_ptr.vmem [resolvable:$true] %s1185_s10 }
  0x29   :  { %1612 = vmatpush3.bf16.msra.mxu0 %v1713_v0  ;;  %1699 = vmatpush3.bf16.msra.mxu1 %v1713_v0  ;;  %v1717_v5 = vld [vmem:[#allocation5 + $0x20] sm:$0xff]   ;;  %v1718_v6 = vld [vmem:[#allocation5 + $0x28] sm:$0xff]   ;;  %v1719_v7 = vld [vmem:[#allocation5 + $0x30] sm:$0xff]   ;;  %s1797_s11 = scalar_lea.vmem %s1186_s10, 4096  ;;  %p1802_p3 = scmp.lt.s32.totalorder %s1186_s10, %s1186_s10 }
  0x2a   :  { %1613 = vmatprep.subr.bf16.mxu0 %v1714_v1  ;;  %1692 = vmatprep.subr.bf16.mxu1 %v1714_v1  ;;  %v1720_v8 = vld [vmem:[#allocation5 + $0x38] sm:$0xff]   ;;  %v1737_v9 = vld [vmem:[#allocation2 + $0x80] sm:$0xff]   ;;  %v1722_v10 = vld [vmem:[#allocation2 + $0x8] sm:$0xff]   ;;  %p1798_p2 = scmp.ne.s32.totalorder %s1186_s10, %s1797_s11  ;;  %p1803_p4 = scmp.lt.s32.totalorder %s1797_s11, %s1797_s11 }
  0x2b   :  { %1627 = vmatprep.mubr.bf16.mxu0 %v1721_v4  ;;  %1659 = vmatprep.mubr.bf16.mxu1 %v1737_v9  ;;  %v1723_v11 = vld [vmem:[#allocation2 + $0x10] sm:$0xff]   ;;  %v1738_v12 = vld [vmem:[#allocation2 + $0x88] sm:$0xff]   ;;  %v1724_v14 = vld [vmem:[#allocation2 + $0x18] sm:$0xff]  }
  0x2c   :  { %v1739_v13 = vld [vmem:[#allocation2 + $0x90] sm:$0xff]   ;;  %v1725_v15 = vld [vmem:[#allocation2 + $0x20] sm:$0xff]   ;;  %v1740_v16 = vld [vmem:[#allocation2 + $0x98] sm:$0xff]   ;;  %p1804_p5 = por %p1803_p4, %p1802_p3 }
  0x2d   :  { %1614 = vmatpush3.bf16.msra.mxu0 %v1714_v1  ;;  %1700 = vmatpush3.bf16.msra.mxu1 %v1714_v1  ;;  %v1741_v17 = vld [vmem:[#allocation2 + $0xa0] sm:$0xff]   ;;  %v1726_v18 = vld [vmem:[#allocation2 + $0x28] sm:$0xff]   ;;  %v1727_v20 = vld [vmem:[#allocation2 + $0x30] sm:$0xff]  }
  0x2e   :  { %1615 = vmatprep.subr.bf16.mxu0 %v1715_v2  ;;  %1693 = vmatprep.subr.bf16.mxu1 %v1715_v2  ;;  %v1742_v19 = vld [vmem:[#allocation2 + $0xa8] sm:$0xff]   ;;  %v1743_v21 = vld [vmem:[#allocation2 + $0xb0] sm:$0xff]   ;;  %v1728_v22 = vld [vmem:[#allocation2 + $0x38] sm:$0xff]   ;;  %p1805_p6 = pnand %p1804_p5, %p1798_p2 }
  0x2f   :  { %v1744_v23 = vld [vmem:[#allocation2 + $0xb8] sm:$0xff]   ;;  %v1729_v24 = vld [vmem:[#allocation2 + $0x40] sm:$0xff]   ;;  %v1730_v26 = vld [vmem:[#allocation2 + $0x48] sm:$0xff]  }
  0x30   :  { %v1745_v25 = vld [vmem:[#allocation2 + $0xc0] sm:$0xff]   ;;  %v1746_v27 = vld [vmem:[#allocation2 + $0xc8] sm:$0xff]   ;;  %v1731_v28 = vld [vmem:[#allocation2 + $0x50] sm:$0xff]  }
  0x31   :  { %1616 = vmatpush3.bf16.msra.mxu0 %v1715_v2  ;;  %1701 = vmatpush3.bf16.msra.mxu1 %v1715_v2  ;;  %v1747_v29 = vld [vmem:[#allocation2 + $0xd0] sm:$0xff]   ;;  %v1732_v30 = vld [vmem:[#allocation2 + $0x58] sm:$0xff]   ;;  %v1733_v32 = vld [vmem:[#allocation2 + $0x60] sm:$0xff]  }
  0x32   :  { %1617 = vmatprep.subr.bf16.mxu0 %v1716_v3  ;;  %1694 = vmatprep.subr.bf16.mxu1 %v1716_v3  ;;  %v1748_v31 = vld [vmem:[#allocation2 + $0xd8] sm:$0xff]   ;;  %v1749_v33 = vld [vmem:[#allocation2 + $0xe0] sm:$0xff]   ;;  %v1734_v34 = vld [vmem:[#allocation2 + $0x68] sm:$0xff]  }
  0x33   :  { %v1750_v35 = vld [vmem:[#allocation2 + $0xe8] sm:$0xff]   ;;  %v1735_v36 = vld [vmem:[#allocation2 + $0x70] sm:$0xff]   ;;  %v1736_v38 = vld [vmem:[#allocation2 + $0x78] sm:$0xff]  }
  0x34   :  { %v1751_v37 = vld [vmem:[#allocation2 + $0xf0] sm:$0xff]   ;;  %v1752_v39 = vld [vmem:[#allocation2 + $0xf8] sm:$0xff]  }
  0x35   :  { %1618 = vmatpush3.bf16.msra.mxu0 %v1716_v3  ;;  %1702 = vmatpush3.bf16.msra.mxu1 %v1716_v3 }
  0x36   :  { %1619 = vmatprep.subr.bf16.mxu0 %v1717_v5  ;;  %1695 = vmatprep.subr.bf16.mxu1 %v1717_v5 }
  0x39   :  { %1620 = vmatpush3.bf16.msra.mxu0 %v1717_v5  ;;  %1703 = vmatpush3.bf16.msra.mxu1 %v1717_v5 }
  0x3a   :  { %1621 = vmatprep.subr.bf16.mxu0 %v1718_v6  ;;  %1696 = vmatprep.subr.bf16.mxu1 %v1718_v6 }
  0x3d   :  { %1622 = vmatpush3.bf16.msra.mxu0 %v1718_v6  ;;  %1704 = vmatpush3.bf16.msra.mxu1 %v1718_v6 }
  0x3e   :  { %1623 = vmatprep.subr.bf16.mxu0 %v1719_v7  ;;  %1697 = vmatprep.subr.bf16.mxu1 %v1719_v7 }
  0x41   :  { %1624 = vmatpush3.bf16.msra.mxu0 %v1719_v7  ;;  %1705 = vmatpush3.bf16.msra.mxu1 %v1719_v7 }
  0x42   :  { %1625 = vmatprep.subr.bf16.mxu0 %v1720_v8  ;;  %1698 = vmatprep.subr.bf16.mxu1 %v1720_v8 }
  0x45   :  { %1626 = vmatpush3.bf16.msra.mxu0 %v1720_v8  ;;  %1706 = vmatpush3.bf16.msra.mxu1 %v1720_v8 }
  0x48   :  { %1628 = vmatmul.mubr.bf16.vlgmr.msra.gmra.mrb[0].mxu0 %v1722_v10  ;;  %1660 = vmatmul.mubr.bf16.vlgmr.msra.gmra.mrb[0].mxu1 %v1738_v12 }
  0x49   :  { %1631 = vmatprep.mubr.bf16.mxu0 %v1723_v11  ;;  %1663 = vmatprep.mubr.bf16.mxu1 %v1739_v13 }
  0x50   :  { %1632 = vmatmul.mubr.bf16.gmra.mrb[4].mxu0 %v1724_v14  ;;  %1664 = vmatmul.mubr.bf16.gmra.mrb[4].mxu1 %v1740_v16 }
  0x51   :  { %1635 = vmatprep.mubr.bf16.mxu0 %v1725_v15  ;;  %1667 = vmatprep.mubr.bf16.mxu1 %v1741_v17 }
  0x58   :  { %1636 = vmatmul.mubr.bf16.gmra.mrb[8].mxu0 %v1726_v18  ;;  %1668 = vmatmul.mubr.bf16.gmra.mrb[8].mxu1 %v1742_v19 }
  0x59   :  { %1639 = vmatprep.mubr.bf16.mxu0 %v1727_v20  ;;  %1671 = vmatprep.mubr.bf16.mxu1 %v1743_v21 }
  0x60   :  { %1640 = vmatmul.mubr.bf16.gmra.mrb[12].mxu0 %v1728_v22  ;;  %1672 = vmatmul.mubr.bf16.gmra.mrb[12].mxu1 %v1744_v23 }
  0x61   :  { %1643 = vmatprep.mubr.bf16.mxu0 %v1729_v24  ;;  %1675 = vmatprep.mubr.bf16.mxu1 %v1745_v25 }
  0x68   :  { %1644 = vmatmul.mubr.bf16.gmra.mrb[16].mxu0 %v1730_v26  ;;  %1676 = vmatmul.mubr.bf16.gmra.mrb[16].mxu1 %v1746_v27 }
  0x69   :  { %1647 = vmatprep.mubr.bf16.mxu0 %v1731_v28  ;;  %1679 = vmatprep.mubr.bf16.mxu1 %v1747_v29 }
  0x70   :  { %1648 = vmatmul.mubr.bf16.gmra.mrb[20].mxu0 %v1732_v30  ;;  %1680 = vmatmul.mubr.bf16.gmra.mrb[20].mxu1 %v1748_v31 }
  0x71   :  { %1651 = vmatprep.mubr.bf16.mxu0 %v1733_v32  ;;  %1683 = vmatprep.mubr.bf16.mxu1 %v1749_v33 }
  0x78   :  { %1652 = vmatmul.mubr.bf16.gmra.mrb[24].mxu0 %v1734_v34  ;;  %1684 = vmatmul.mubr.bf16.gmra.mrb[24].mxu1 %v1750_v35 }
  0x79   :  { %1655 = vmatprep.mubr.bf16.mxu0 %v1735_v36  ;;  %1687 = vmatprep.mubr.bf16.mxu1 %v1751_v37 }
  0x80   :  { %1656 = vmatmul.mubr.bf16.gmra.mrb[28].mxu0 %v1736_v38  ;;  %1688 = vmatmul.mubr.bf16.gmra.mrb[28].mxu1 %v1752_v39 }
 0x11b   :  { %v1629_v40 = vpop.f32.mrb[0].mxu0  ;;  %v1905_v41 = vpop.f32.mrb[0].mxu1 }
 0x11c   :  { %v398_v42 = vpop.f32.mrb[1].mxu0  ;;  %v1907_v43 = vpop.f32.mrb[1].mxu1  ;;  %v1044_v55 = vmul.f32 %v1629_v40, %v1629_v40 }
 0x11d   :  { %v1630_v44 = vpop.f32.mrb[2].mxu0  ;;  %v1909_v45 = vpop.f32.mrb[2].mxu1  ;;  %v1042_v46 = vmul.f32 %v398_v42, %v398_v42 }
 0x11e   :  { %v1388_v47 = vpack.c.bf16 %v1630_v44, %v1629_v40  ;;  %v401_v48 = vpop.f32.mrb[3].mxu0  ;;  %v1468_v49 = vpack.c.bf16 %v1909_v45, %v1905_v41  ;;  %v1913_v50 = vpop.f32.mrb[3].mxu1  ;;  %v1045_v58 = vmul.f32 %v1630_v44, %v1630_v44 }
 0x11f   :  { %v1383_v51 = vpack.c.bf16 %v401_v48, %v398_v42  ;;  %v973_v52 = vadd.f32 %v401_v48, %v398_v42  ;;  %v1043_v53 = vmul.f32 %v401_v48, %v401_v48  ;;  %v1463_v54 = vpack.c.bf16 %v1913_v50, %v1907_v43 }
 0x120   :  { %1540 = vst [vmem:[#allocation7 + $0x8] sm:$0xff] %v1388_v47   ;;  %1556 = vst [vmem:[#allocation7 + $0x88] sm:$0xff] %v1468_v49  }
 0x121   :  { %1384 = vst [vmem:[#allocation7] sm:$0xff] %v1383_v51   ;;  %v974_v56 = vadd.f32 %v1629_v40, %v973_v52  ;;  %v1106_v57 = vadd.f32 %v1043_v53, %v1042_v46  ;;  %1555 = vst [vmem:[#allocation7 + $0x80] sm:$0xff] %v1463_v54  }
 0x123   :  { %v1107_v59 = vadd.f32 %v1106_v57, %v1044_v55  ;;  %v1633_v60 = vpop.f32.mrb[4].mxu0  ;;  %v975_v61 = vadd.f32 %v1630_v44, %v974_v56  ;;  %v1917_v62 = vpop.f32.mrb[4].mxu1 }
 0x124   :  { %v414_v63 = vpop.f32.mrb[5].mxu0  ;;  %v1919_v0 = vpop.f32.mrb[5].mxu1  ;;  %v1048_v15 = vmul.f32 %v1633_v60, %v1633_v60 }
 0x125   :  { %v976_v1 = vadd.f32 %v975_v61, %v414_v63  ;;  %v1046_v2 = vmul.f32 %v414_v63, %v414_v63  ;;  %v1108_v3 = vadd.f32 %v1107_v59, %v1045_v58  ;;  %v1634_v4 = vpop.f32.mrb[6].mxu0  ;;  %v1921_v5 = vpop.f32.mrb[6].mxu1 }
 0x126   :  { %v1398_v6 = vpack.c.bf16 %v1634_v4, %v1633_v60  ;;  %v417_v7 = vpop.f32.mrb[7].mxu0  ;;  %v1478_v8 = vpack.c.bf16 %v1921_v5, %v1917_v62  ;;  %v1925_v9 = vpop.f32.mrb[7].mxu1  ;;  %v1049_v18 = vmul.f32 %v1634_v4, %v1634_v4 }
 0x127   :  { %v1109_v10 = vadd.f32 %v1108_v3, %v1046_v2  ;;  %v1393_v11 = vpack.c.bf16 %v417_v7, %v414_v63  ;;  %v977_v12 = vadd.f32 %v976_v1, %v417_v7  ;;  %v1047_v13 = vmul.f32 %v417_v7, %v417_v7 }
 0x128   :  { %1542 = vst [vmem:[#allocation7 + $0x18] sm:$0xff] %v1398_v6   ;;  %1558 = vst [vmem:[#allocation7 + $0x98] sm:$0xff] %v1478_v8   ;;  %v1473_v14 = vpack.c.bf16 %v1925_v9, %v1919_v0 }
 0x129   :  { %1541 = vst [vmem:[#allocation7 + $0x10] sm:$0xff] %v1393_v11   ;;  %v978_v16 = vadd.f32 %v1633_v60, %v977_v12  ;;  %v1110_v17 = vadd.f32 %v1109_v10, %v1047_v13 }
 0x12a   :  { %1557 = vst [vmem:[#allocation7 + $0x90] sm:$0xff] %v1473_v14  }
 0x12b   :  { %v1111_v19 = vadd.f32 %v1110_v17, %v1048_v15  ;;  %v1637_v20 = vpop.f32.mrb[8].mxu0  ;;  %v979_v21 = vadd.f32 %v1634_v4, %v978_v16  ;;  %v1929_v22 = vpop.f32.mrb[8].mxu1 }
 0x12c   :  { %v430_v23 = vpop.f32.mrb[9].mxu0  ;;  %v1931_v24 = vpop.f32.mrb[9].mxu1  ;;  %v1052_v39 = vmul.f32 %v1637_v20, %v1637_v20 }
 0x12d   :  { %v980_v25 = vadd.f32 %v979_v21, %v430_v23  ;;  %v1050_v26 = vmul.f32 %v430_v23, %v430_v23  ;;  %v1112_v27 = vadd.f32 %v1111_v19, %v1049_v18  ;;  %v1638_v28 = vpop.f32.mrb[10].mxu0  ;;  %v1933_v29 = vpop.f32.mrb[10].mxu1 }
 0x12e   :  { %v1408_v30 = vpack.c.bf16 %v1638_v28, %v1637_v20  ;;  %v433_v31 = vpop.f32.mrb[11].mxu0  ;;  %v1488_v32 = vpack.c.bf16 %v1933_v29, %v1929_v22  ;;  %v1937_v33 = vpop.f32.mrb[11].mxu1  ;;  %v1053_v44 = vmul.f32 %v1638_v28, %v1638_v28 }
 0x12f   :  { %v1113_v34 = vadd.f32 %v1112_v27, %v1050_v26  ;;  %v1403_v35 = vpack.c.bf16 %v433_v31, %v430_v23  ;;  %v981_v36 = vadd.f32 %v980_v25, %v433_v31  ;;  %v1051_v37 = vmul.f32 %v433_v31, %v433_v31 }
 0x130   :  { %1544 = vst [vmem:[#allocation7 + $0x28] sm:$0xff] %v1408_v30   ;;  %1560 = vst [vmem:[#allocation7 + $0xa8] sm:$0xff] %v1488_v32   ;;  %v1483_v38 = vpack.c.bf16 %v1937_v33, %v1931_v24 }
 0x131   :  { %1543 = vst [vmem:[#allocation7 + $0x20] sm:$0xff] %v1403_v35   ;;  %v982_v40 = vadd.f32 %v1637_v20, %v981_v36  ;;  %v1114_v42 = vadd.f32 %v1113_v34, %v1051_v37 }
 0x132   :  { %1559 = vst [vmem:[#allocation7 + $0xa0] sm:$0xff] %v1483_v38  }
 0x133   :  { %v1115_v46 = vadd.f32 %v1114_v42, %v1052_v39  ;;  %v1641_v47 = vpop.f32.mrb[12].mxu0  ;;  %v983_v48 = vadd.f32 %v1638_v28, %v982_v40  ;;  %v1941_v49 = vpop.f32.mrb[12].mxu1 }
 0x134   :  { %v446_v51 = vpop.f32.mrb[13].mxu0  ;;  %v1943_v52 = vpop.f32.mrb[13].mxu1  ;;  %v1056_v6 = vmul.f32 %v1641_v47, %v1641_v47 }
 0x135   :  { %v984_v53 = vadd.f32 %v983_v48, %v446_v51  ;;  %v1054_v54 = vmul.f32 %v446_v51, %v446_v51  ;;  %v1116_v55 = vadd.f32 %v1115_v46, %v1053_v44  ;;  %v1642_v56 = vpop.f32.mrb[14].mxu0  ;;  %v1945_v57 = vpop.f32.mrb[14].mxu1 }
 0x136   :  { %v1418_v58 = vpack.c.bf16 %v1642_v56, %v1641_v47  ;;  %v449_v59 = vpop.f32.mrb[15].mxu0  ;;  %v1498_v60 = vpack.c.bf16 %v1945_v57, %v1941_v49  ;;  %v1949_v61 = vpop.f32.mrb[15].mxu1  ;;  %v1057_v10 = vmul.f32 %v1642_v56, %v1642_v56 }
 0x137   :  { %v1117_v63 = vadd.f32 %v1116_v55, %v1054_v54  ;;  %v1413_v1 = vpack.c.bf16 %v449_v59, %v446_v51  ;;  %v985_v2 = vadd.f32 %v984_v53, %v449_v59  ;;  %v1055_v3 = vmul.f32 %v449_v59, %v449_v59 }
 0x138   :  { %1546 = vst [vmem:[#allocation7 + $0x38] sm:$0xff] %v1418_v58   ;;  %1562 = vst [vmem:[#allocation7 + $0xb8] sm:$0xff] %v1498_v60   ;;  %v1493_v4 = vpack.c.bf16 %v1949_v61, %v1943_v52 }
 0x139   :  { %1545 = vst [vmem:[#allocation7 + $0x30] sm:$0xff] %v1413_v1   ;;  %v986_v7 = vadd.f32 %v1641_v47, %v985_v2  ;;  %v1118_v8 = vadd.f32 %v1117_v63, %v1055_v3 }
 0x13a   :  { %1561 = vst [vmem:[#allocation7 + $0xb0] sm:$0xff] %v1493_v4  }
 0x13b   :  { %v1119_v11 = vadd.f32 %v1118_v8, %v1056_v6  ;;  %v1645_v12 = vpop.f32.mrb[16].mxu0  ;;  %v987_v13 = vadd.f32 %v1642_v56, %v986_v7  ;;  %v1953_v14 = vpop.f32.mrb[16].mxu1 }
 0x13c   :  { %v462_v15 = vpop.f32.mrb[17].mxu0  ;;  %v1955_v16 = vpop.f32.mrb[17].mxu1  ;;  %v1060_v35 = vmul.f32 %v1645_v12, %v1645_v12 }
 0x13d   :  { %v988_v17 = vadd.f32 %v987_v13, %v462_v15  ;;  %v1058_v18 = vmul.f32 %v462_v15, %v462_v15  ;;  %v1120_v19 = vadd.f32 %v1119_v11, %v1057_v10  ;;  %v1646_v20 = vpop.f32.mrb[18].mxu0  ;;  %v1957_v21 = vpop.f32.mrb[18].mxu1 }
 0x13e   :  { %v1428_v23 = vpack.c.bf16 %v1646_v20, %v1645_v12  ;;  %v465_v25 = vpop.f32.mrb[19].mxu0  ;;  %v1508_v26 = vpack.c.bf16 %v1957_v21, %v1953_v14  ;;  %v1961_v27 = vpop.f32.mrb[19].mxu1  ;;  %v1061_v38 = vmul.f32 %v1646_v20, %v1646_v20 }
 0x13f   :  { %v1121_v28 = vadd.f32 %v1120_v19, %v1058_v18  ;;  %v1423_v30 = vpack.c.bf16 %v465_v25, %v462_v15  ;;  %v989_v31 = vadd.f32 %v988_v17, %v465_v25  ;;  %v1059_v32 = vmul.f32 %v465_v25, %v465_v25 }
 0x140   :  { %1548 = vst [vmem:[#allocation7 + $0x48] sm:$0xff] %v1428_v23   ;;  %1564 = vst [vmem:[#allocation7 + $0xc8] sm:$0xff] %v1508_v26   ;;  %v1503_v34 = vpack.c.bf16 %v1961_v27, %v1955_v16 }
 0x141   :  { %1547 = vst [vmem:[#allocation7 + $0x40] sm:$0xff] %v1423_v30   ;;  %v990_v36 = vadd.f32 %v1645_v12, %v989_v31  ;;  %v1122_v37 = vadd.f32 %v1121_v28, %v1059_v32 }
 0x142   :  { %1563 = vst [vmem:[#allocation7 + $0xc0] sm:$0xff] %v1503_v34  }
 0x143   :  { %v1123_v39 = vadd.f32 %v1122_v37, %v1060_v35  ;;  %v1649_v40 = vpop.f32.mrb[20].mxu0  ;;  %v991_v42 = vadd.f32 %v1646_v20, %v990_v36  ;;  %v1965_v44 = vpop.f32.mrb[20].mxu1 }
 0x144   :  { %v478_v46 = vpop.f32.mrb[21].mxu0  ;;  %v1967_v47 = vpop.f32.mrb[21].mxu1  ;;  %v1064_v6 = vmul.f32 %v1649_v40, %v1649_v40 }
 0x145   :  { %v992_v48 = vadd.f32 %v991_v42, %v478_v46  ;;  %v1062_v51 = vmul.f32 %v478_v46, %v478_v46  ;;  %v1124_v53 = vadd.f32 %v1123_v39, %v1061_v38  ;;  %v1650_v54 = vpop.f32.mrb[22].mxu0  ;;  %v1969_v55 = vpop.f32.mrb[22].mxu1 }
 0x146   :  { %v1438_v56 = vpack.c.bf16 %v1650_v54, %v1649_v40  ;;  %v481_v58 = vpop.f32.mrb[23].mxu0  ;;  %v1518_v59 = vpack.c.bf16 %v1969_v55, %v1965_v44  ;;  %v1973_v60 = vpop.f32.mrb[23].mxu1  ;;  %v1065_v10 = vmul.f32 %v1650_v54, %v1650_v54 }
 0x147   :  { %v1125_v63 = vadd.f32 %v1124_v53, %v1062_v51  ;;  %v1433_v1 = vpack.c.bf16 %v481_v58, %v478_v46  ;;  %v993_v2 = vadd.f32 %v992_v48, %v481_v58  ;;  %v1063_v3 = vmul.f32 %v481_v58, %v481_v58 }
 0x148   :  { %1550 = vst [vmem:[#allocation7 + $0x58] sm:$0xff] %v1438_v56   ;;  %1566 = vst [vmem:[#allocation7 + $0xd8] sm:$0xff] %v1518_v59   ;;  %v1513_v4 = vpack.c.bf16 %v1973_v60, %v1967_v47 }
 0x149   :  { %1549 = vst [vmem:[#allocation7 + $0x50] sm:$0xff] %v1433_v1   ;;  %v994_v7 = vadd.f32 %v1649_v40, %v993_v2  ;;  %v1126_v8 = vadd.f32 %v1125_v63, %v1063_v3 }
 0x14a   :  { %1565 = vst [vmem:[#allocation7 + $0xd0] sm:$0xff] %v1513_v4  }
 0x14b   :  { %v1127_v11 = vadd.f32 %v1126_v8, %v1064_v6  ;;  %v1653_v12 = vpop.f32.mrb[24].mxu0  ;;  %v995_v13 = vadd.f32 %v1650_v54, %v994_v7  ;;  %v1977_v15 = vpop.f32.mrb[24].mxu1 }
 0x14c   :  { %v494_v17 = vpop.f32.mrb[25].mxu0  ;;  %v1979_v18 = vpop.f32.mrb[25].mxu1  ;;  %v1068_v39 = vmul.f32 %v1653_v12, %v1653_v12 }
 0x14d   :  { %v996_v19 = vadd.f32 %v995_v13, %v494_v17  ;;  %v1066_v20 = vmul.f32 %v494_v17, %v494_v17  ;;  %v1128_v23 = vadd.f32 %v1127_v11, %v1065_v10  ;;  %v1654_v25 = vpop.f32.mrb[26].mxu0  ;;  %v1981_v26 = vpop.f32.mrb[26].mxu1 }
 0x14e   :  { %v1448_v28 = vpack.c.bf16 %v1654_v25, %v1653_v12  ;;  %v497_v30 = vpop.f32.mrb[27].mxu0  ;;  %v1528_v31 = vpack.c.bf16 %v1981_v26, %v1977_v15  ;;  %v1985_v32 = vpop.f32.mrb[27].mxu1  ;;  %v1069_v46 = vmul.f32 %v1654_v25, %v1654_v25 }
 0x14f   :  { %v1129_v34 = vadd.f32 %v1128_v23, %v1066_v20  ;;  %v1443_v35 = vpack.c.bf16 %v497_v30, %v494_v17  ;;  %v997_v36 = vadd.f32 %v996_v19, %v497_v30  ;;  %v1067_v37 = vmul.f32 %v497_v30, %v497_v30 }
 0x150   :  { %1552 = vst [vmem:[#allocation7 + $0x68] sm:$0xff] %v1448_v28   ;;  %1568 = vst [vmem:[#allocation7 + $0xe8] sm:$0xff] %v1528_v31   ;;  %v1523_v38 = vpack.c.bf16 %v1985_v32, %v1979_v18  ;;  %v1074_v31 = vmul.f32 %v1907_v43, %v1907_v43 }
 0x151   :  { %1551 = vst [vmem:[#allocation7 + $0x60] sm:$0xff] %v1443_v35   ;;  %v998_v40 = vadd.f32 %v1653_v12, %v997_v36  ;;  %v1130_v42 = vadd.f32 %v1129_v34, %v1067_v37 }
 0x152   :  { %1567 = vst [vmem:[#allocation7 + $0xe0] sm:$0xff] %v1523_v38  }
 0x153   :  { %v1131_v48 = vadd.f32 %v1130_v42, %v1068_v39  ;;  %v1657_v51 = vpop.f32.mrb[28].mxu0  ;;  %v999_v53 = vadd.f32 %v1654_v25, %v998_v40  ;;  %v1989_v54 = vpop.f32.mrb[28].mxu1 }
 0x154   :  { %v510_v56 = vpop.f32.mrb[29].mxu0  ;;  %v1991_v58 = vpop.f32.mrb[29].mxu1  ;;  %v1072_v19 = vmul.f32 %v1657_v51, %v1657_v51 }
 0x155   :  { %v1000_v59 = vadd.f32 %v999_v53, %v510_v56  ;;  %v1070_v63 = vmul.f32 %v510_v56, %v510_v56  ;;  %v1132_v1 = vadd.f32 %v1131_v48, %v1069_v46  ;;  %v1658_v2 = vpop.f32.mrb[30].mxu0  ;;  %v1993_v3 = vpop.f32.mrb[30].mxu1 }
 0x156   :  { %v1458_v4 = vpack.c.bf16 %v1658_v2, %v1657_v51  ;;  %v513_v6 = vpop.f32.mrb[31].mxu0  ;;  %v1538_v7 = vpack.c.bf16 %v1993_v3, %v1989_v54  ;;  %v1997_v8 = vpop.f32.mrb[31].mxu1  ;;  %v1073_v25 = vmul.f32 %v1658_v2, %v1658_v2 }
 0x157   :  { %v1133_v10 = vadd.f32 %v1132_v1, %v1070_v63  ;;  %v1453_v11 = vpack.c.bf16 %v513_v6, %v510_v56  ;;  %v1001_v12 = vadd.f32 %v1000_v59, %v513_v6  ;;  %v1071_v13 = vmul.f32 %v513_v6, %v513_v6 }
 0x158   :  { %1554 = vst [vmem:[#allocation7 + $0x78] sm:$0xff] %v1458_v4   ;;  %1570 = vst [vmem:[#allocation7 + $0xf8] sm:$0xff] %v1538_v7   ;;  %v1533_v17 = vpack.c.bf16 %v1997_v8, %v1991_v58 }
 0x159   :  { %1553 = vst [vmem:[#allocation7 + $0x70] sm:$0xff] %v1453_v11   ;;  %v1002_v20 = vadd.f32 %v1657_v51, %v1001_v12  ;;  %v1134_v23 = vadd.f32 %v1133_v10, %v1071_v13 }
 0x15a   :  { %1569 = vst [vmem:[#allocation7 + $0xf0] sm:$0xff] %v1533_v17  }
 0x15b   :  { %v1135_v28 = vadd.f32 %v1134_v23, %v1072_v19  ;;  %v1003_v30 = vadd.f32 %v1658_v2, %v1002_v20 }
 0x15c   :  { %1808 = shalt.err (!%p1805_p6)
}
 0x15d   :  { %s1809_s14 = scalar_lea.hbm %s2126_s2, 4096 }
 0x15e   :  { %p1810_p7 = scmp.ne.s32.totalorder %s2126_s2, %s1809_s14  ;;  %p1813_p8 = scmp.lt.u32.totalorder %s1809_s14, %s2126_s2 }
 0x160   :  { %p1815_p9 = pnand %p1813_p8, %p1810_p7 }
 0x162   :  { %1818 = shalt.err (!%p1815_p9)
}
 0x163   :  { %1191 = dma.vmem_to_hbm [thread:$0]  %s1186_s10, 4096, %s2126_s2, [#allocation4], %s1850_s22, %s1850_s22, %s1851_s23   ;;  %v1004_v34 = vadd.f32 %v1003_v30, %v1907_v43  ;;  %v1136_v35 = vadd.f32 %v1135_v28, %v1073_v25  ;;  %v1075_v38 = vmul.f32 %v1913_v50, %v1913_v50  ;;  %v1076_v39 = vmul.f32 %v1905_v41, %v1905_v41 }
 0x164   :  { %v1077_v46 = vmul.f32 %v1909_v45, %v1909_v45  ;;  %v1078_v43 = vmul.f32 %v1919_v0, %v1919_v0  ;;  %v1079_v63 = vmul.f32 %v1925_v9, %v1925_v9  ;;  %v1083_v12 = vmul.f32 %v1937_v33, %v1937_v33  ;;  %s1854_s2 = smov [#allocation8]  }
 0x165   :  { %v1137_v36 = vadd.f32 %v1136_v35, %v1074_v31  ;;  %v1005_v37 = vadd.f32 %v1004_v34, %v1913_v50  ;;  %v1087_v30 = vmul.f32 %v1949_v61, %v1949_v61  ;;  %vm1175_vm0 = vcmask 1040384   ;;  %s1198_s21 = sshll.u32 %s1854_s2, 4  ;;  %s1199_s21 = int_to_ptr.vmem [resolvable:$true] %s1198_s21 }
 0x166   :  { %vm1177_vm1 = vcmask 1041408   ;;  %s1819_s22 = scalar_lea.vmem %s1199_s21, 128  ;;  %p1824_p11 = scmp.lt.s32.totalorder %s1199_s21, %s1199_s21 }
 0x167   :  { %v1006_v40 = vadd.f32 %v1905_v41, %v1005_v37  ;;  %v1138_v42 = vadd.f32 %v1137_v36, %v1075_v38  ;;  %v1080_v41 = vmul.f32 %v1917_v62, %v1917_v62  ;;  %p1820_p10 = scmp.ne.s32.totalorder %s1199_s21, %s1819_s22  ;;  %p1825_p12 = scmp.lt.s32.totalorder %s1819_s22, %s1819_s22 }
 0x169   :  { %v1139_v48 = vadd.f32 %v1138_v42, %v1076_v39  ;;  %v1007_v51 = vadd.f32 %v1909_v45, %v1006_v40  ;;  %v1081_v45 = vmul.f32 %v1921_v5, %v1921_v5  ;;  %v1091_v40 = vmul.f32 %v1961_v27, %v1961_v27  ;;  %p1826_p13 = por %p1825_p12, %p1824_p11 }
 0x16b   :  { %v1008_v53 = vadd.f32 %v1007_v51, %v1919_v0  ;;  %v1140_v56 = vadd.f32 %v1139_v48, %v1077_v46  ;;  %v1082_v0 = vmul.f32 %v1931_v24, %v1931_v24  ;;  %p1827_p0 = pnand %p1826_p13, %p1820_p10 }
 0x16d   :  { %v1141_v59 = vadd.f32 %v1140_v56, %v1078_v43  ;;  %v1009_v50 = vadd.f32 %v1008_v53, %v1925_v9 }
 0x16f   :  { %v1010_v1 = vadd.f32 %v1917_v62, %v1009_v50  ;;  %v1142_v2 = vadd.f32 %v1141_v59, %v1079_v63  ;;  %v1084_v62 = vmul.f32 %v1929_v22, %v1929_v22  ;;  %v1095_v59 = vmul.f32 %v1973_v60, %v1973_v60 }
 0x171   :  { %v1143_v4 = vadd.f32 %v1142_v2, %v1080_v41  ;;  %v1011_v6 = vadd.f32 %v1921_v5, %v1010_v1  ;;  %v1085_v5 = vmul.f32 %v1933_v29, %v1933_v29 }
 0x173   :  { %v1012_v7 = vadd.f32 %v1011_v6, %v1931_v24  ;;  %v1144_v10 = vadd.f32 %v1143_v4, %v1081_v45  ;;  %v1086_v24 = vmul.f32 %v1943_v52, %v1943_v52  ;;  %v1099_v6 = vmul.f32 %v1985_v32, %v1985_v32 }
 0x175   :  { %v1145_v11 = vadd.f32 %v1144_v10, %v1082_v0  ;;  %v1013_v9 = vadd.f32 %v1012_v7, %v1937_v33 }
 0x177   :  { %v1014_v13 = vadd.f32 %v1929_v22, %v1013_v9  ;;  %v1146_v17 = vadd.f32 %v1145_v11, %v1083_v12  ;;  %v1088_v22 = vmul.f32 %v1941_v49, %v1941_v49 }
 0x179   :  { %v1147_v19 = vadd.f32 %v1146_v17, %v1084_v62  ;;  %v1015_v20 = vadd.f32 %v1933_v29, %v1014_v13  ;;  %v1089_v29 = vmul.f32 %v1945_v57, %v1945_v57  ;;  %v1103_v13 = vmul.f32 %v1997_v8, %v1997_v8 }
 0x17b   :  { %v1016_v23 = vadd.f32 %v1015_v20, %v1943_v52  ;;  %v1148_v25 = vadd.f32 %v1147_v19, %v1085_v5  ;;  %v1090_v52 = vmul.f32 %v1955_v16, %v1955_v16 }
 0x17d   :  { %v1149_v28 = vadd.f32 %v1148_v25, %v1086_v24  ;;  %v1017_v33 = vadd.f32 %v1016_v23, %v1949_v61 }
 0x17f   :  { %v1018_v31 = vadd.f32 %v1941_v49, %v1017_v33  ;;  %v1150_v34 = vadd.f32 %v1149_v28, %v1087_v30  ;;  %v1092_v49 = vmul.f32 %v1953_v14, %v1953_v14 }
 0x181   :  { %v1151_v35 = vadd.f32 %v1150_v34, %v1088_v22  ;;  %v1019_v36 = vadd.f32 %v1945_v57, %v1018_v31  ;;  %v1093_v57 = vmul.f32 %v1957_v21, %v1957_v21 }
 0x183   :  { %v1020_v37 = vadd.f32 %v1019_v36, %v1955_v16  ;;  %v1152_v38 = vadd.f32 %v1151_v35, %v1089_v29  ;;  %v1094_v16 = vmul.f32 %v1967_v47, %v1967_v47 }
 0x185   :  { %v1153_v39 = vadd.f32 %v1152_v38, %v1090_v52  ;;  %v1021_v61 = vadd.f32 %v1020_v37, %v1961_v27 }
 0x187   :  { %v1022_v42 = vadd.f32 %v1953_v14, %v1021_v61  ;;  %v1154_v46 = vadd.f32 %v1153_v39, %v1091_v40  ;;  %v1096_v14 = vmul.f32 %v1965_v44, %v1965_v44 }
 0x189   :  { %v1155_v48 = vadd.f32 %v1154_v46, %v1092_v49  ;;  %v1023_v51 = vadd.f32 %v1957_v21, %v1022_v42  ;;  %v1097_v21 = vmul.f32 %v1969_v55, %v1969_v55 }
 0x18b   :  { %v1024_v43 = vadd.f32 %v1023_v51, %v1967_v47  ;;  %v1156_v53 = vadd.f32 %v1155_v48, %v1093_v57  ;;  %v1098_v47 = vmul.f32 %v1979_v18, %v1979_v18 }
 0x18d   :  { %v1157_v56 = vadd.f32 %v1156_v53, %v1094_v16  ;;  %v1025_v27 = vadd.f32 %v1024_v43, %v1973_v60 }
 0x18f   :  { %v1026_v50 = vadd.f32 %v1965_v44, %v1025_v27  ;;  %v1158_v63 = vadd.f32 %v1157_v56, %v1095_v59  ;;  %v1100_v44 = vmul.f32 %v1977_v15, %v1977_v15 }
 0x191   :  { %v1159_v41 = vadd.f32 %v1158_v63, %v1096_v14  ;;  %v1027_v1 = vadd.f32 %v1969_v55, %v1026_v50  ;;  %v1101_v55 = vmul.f32 %v1981_v26, %v1981_v26 }
 0x193   :  { %v1028_v2 = vadd.f32 %v1027_v1, %v1979_v18  ;;  %v1160_v45 = vadd.f32 %v1159_v41, %v1097_v21  ;;  %v1102_v18 = vmul.f32 %v1991_v58, %v1991_v58 }
 0x195   :  { %v1161_v4 = vadd.f32 %v1160_v45, %v1098_v47  ;;  %v1029_v60 = vadd.f32 %v1028_v2, %v1985_v32 }
 0x197   :  { %v1030_v0 = vadd.f32 %v1977_v15, %v1029_v60  ;;  %v1162_v7 = vadd.f32 %v1161_v4, %v1099_v6  ;;  %v1104_v15 = vmul.f32 %v1989_v54, %v1989_v54 }
 0x199   :  { %v1163_v10 = vadd.f32 %v1162_v7, %v1100_v44  ;;  %v1031_v11 = vadd.f32 %v1981_v26, %v1030_v0  ;;  %v1105_v26 = vmul.f32 %v1993_v3, %v1993_v3 }
 0x19b   :  { %v1032_v9 = vadd.f32 %v1031_v11, %v1991_v58  ;;  %v1164_v12 = vadd.f32 %v1163_v10, %v1101_v55 }
 0x19d   :  { %v1165_v62 = vadd.f32 %v1164_v12, %v1102_v18  ;;  %v1033_v32 = vadd.f32 %v1032_v9, %v1997_v8 }
 0x19f   :  { %v1034_v17 = vadd.f32 %v1989_v54, %v1033_v32  ;;  %v1166_v5 = vadd.f32 %v1165_v62, %v1103_v13 }
 0x1a1   :  { %v1035_v19 = vadd.f32 %v1993_v3, %v1034_v17  ;;  %v1167_v20 = vadd.f32 %v1166_v5, %v1104_v15 }
 0x1a3   :  { %v1036_v58 = vrot.slane %v1035_v19, 4  ;;  %v1168_v24 = vadd.f32 %v1167_v20, %v1105_v26 }
 0x1a5   :  { %v1037_v23 = vadd.f32 %v1036_v58, %v1035_v19  ;;  %v1169_v25 = vrot.slane %v1168_v24, 4 }
 0x1a7   :  { %v1038_v28 = vrot.slane %v1037_v23, 2  ;;  %v1170_v33 = vadd.f32 %v1169_v25, %v1168_v24 }
 0x1a9   :  { %v1039_v30 = vadd.f32 %v1038_v28, %v1037_v23  ;;  %v1171_v8 = vrot.slane %v1170_v33, 2 }
 0x1ab   :  { %v1040_v22 = vrot.slane %v1039_v30, 1  ;;  %v1172_v31 = vadd.f32 %v1171_v8, %v1170_v33 }
 0x1ad   :  { %v1173_v34 = vrot.slane %v1172_v31, 1  ;;  %v1041_v54 = vadd.f32 %v1040_v22, %v1039_v30 }
 0x1af   :  { %v1174_v29 = vadd.f32 %v1173_v34, %v1172_v31 }
 0x1b1   :  { %v1176_v35 = vsel %vm1175_vm0, %v1041_v54, %v1174_v29 }
 0x1b2   :  { %v1178_v3 = vsel %vm1177_vm1, %v1176_v35, 0.0 }
 0x1b3   :  { %1179 = vst [vmem:[#allocation8] sm:$0xff] %v1178_v3 }
 0x1b4   :  { %1830 = shalt.err (!%p1827_p0)
}
 0x1b5   :  { %s1831_s25 = scalar_lea.hbm %s2127_s3, 128 }
 0x1b6   :  { %p1832_p1 = scmp.ne.s32.totalorder %s2127_s3, %s1831_s25  ;;  %p1835_p2 = scmp.lt.u32.totalorder %s1831_s25, %s2127_s3 }
 0x1b8   :  { %p1837_p3 = pnand %p1835_p2, %p1832_p1 }
 0x1ba   :  { %1840 = shalt.err (!%p1837_p3)
}
 0x1bb   :  { %1201 = dma.vmem_to_hbm [thread:$0]  %s1199_s21, 128, %s2127_s3, [#allocation9]  }
 0x1bc   :  { %1845 = dma.done.wait [#allocation4], 4096  }
 0x1bd   :  { %1846 = vsyncadd [#allocation4], 4294963200 }
 0x1be   :  { %1847 = dma.done.wait [#allocation9], 128  }
 0x1bf   :  { %1848 = vsyncadd [#allocation9], 4294967168 }
 0x1c0   :  { %1208 = vsyncpa [#allocation3], 1 }
 0x1c1   :  { %1209 = vsyncpa [#allocation6], 1 }
 0x1c2   :  { %1210 = vsyncpa [#allocation4], 1 }
 0x1c3   :  { %1211 = vsyncpa [#allocation9], 1 }

</bundles_post_ra>
